<compile_context>
chip_gen: v7x
topology: tpu7x:2x2x1
jax: 0.10.0
libtpu: 0.0.40
codegen_flags: <defaults>
</compile_context>

<pallas_src>
import math

import jax
import jax.numpy as jnp
from jax.experimental import pallas as pl
from jax.experimental.pallas import tpu as pltpu

_INV_SQRT2 = 0.7071067811865476


def _round_up(v, m):
    return -(-v // m) * m


def _mlp_kernel(x_ref, w1_ref, b1_ref, w2_ref, b2_ref, o_ref, acc_ref, xmm_ref):
    """Grid point (i, m): row tile i (parallel), mlp_dim chunk m (reduction)."""
    m = pl.program_id(1)

    @pl.when(m == 0)
    def _init():
        # Zero the f32 accumulator and cast this row tile to the matmul dtype
        # once per row tile (VPU cast is nearly free under the MXU).
        acc_ref[...] = jnp.zeros_like(acc_ref)
        xmm_ref[...] = x_ref[...].astype(xmm_ref.dtype)

    # fc1 chunk on the MXU: (tile_n, H) @ (H, tile_m), f32 accumulation.
    h = jnp.dot(xmm_ref[...], w1_ref[...], preferred_element_type=jnp.float32)
    h = h + b1_ref[...]                                  # bias add in f32
    # Exact-erf GELU (matches torch.nn.functional.gelu, approximate='none').
    h = 0.5 * h * (1.0 + jax.lax.erf(h * _INV_SQRT2))
    # TODO(synk): dropout omitted (eval-mode identity); training-mode dropout
    # would use pltpu.prng_seed / pltpu.prng_random_bits and 1/(1-p) scaling.
    # fc2 chunk: (tile_n, tile_m) @ (tile_m, H), accumulated in f32 scratch.
    acc_ref[...] += jnp.dot(h.astype(w2_ref.dtype), w2_ref[...],
                            preferred_element_type=jnp.float32)

    @pl.when(m == pl.num_programs(1) - 1)
    def _finalize():
        o_ref[...] = (acc_ref[...] + b2_ref[...]).astype(o_ref.dtype)


def prepare_params(w1, b1, w2, b2, *, tile_m=None, matmul_dtype=jnp.bfloat16,
                   resident_weight_budget=16 * 1024 * 1024):
    """One-time weight prep (outside the hot path): pick the mlp_dim chunk,
    zero-pad mlp_dim to a multiple of it, and cast weights to the matmul dtype.

    Returns ((w1_p, b1_p, w2_p, b2_p), tile_m)."""
    hidden, mlp_dim = w1.shape
    w_item = jnp.dtype(matmul_dtype).itemsize
    m128 = _round_up(mlp_dim, 128)
    if tile_m is None:
        # If both padded weights comfortably fit VMEM, keep them fully
        # resident (single M chunk -> constant index_map -> fetched once).
        # Otherwise stream 512-wide chunks along mlp_dim.
        if 2 * hidden * m128 * w_item <= resident_weight_budget:
            tile_m = m128
        else:
            tile_m = 512
    m_p = _round_up(mlp_dim, tile_m)

    def pad_axis(a, axis, new):
        pad = new - a.shape[axis]
        if pad == 0:
            return a
        widths = [(0, 0)] * a.ndim
        widths[axis] = (0, pad)
        return jnp.pad(a, widths)

    # Zero padding of mlp_dim is neutral: padded b1 is 0, GELU(0)=0, padded
    # w2 rows are 0, so padded columns contribute nothing to the accumulator.
    w1_p = pad_axis(w1, 1, m_p).astype(matmul_dtype)
    w2_p = pad_axis(w2, 0, m_p).astype(matmul_dtype)
    b1_p = pad_axis(b1.astype(jnp.float32).reshape(1, -1), 1, m_p)
    b2_p = b2.astype(jnp.float32).reshape(1, -1)
    return (w1_p, b1_p, w2_p, b2_p), tile_m


def mlp_forward(x, w1_p, b1_p, w2_p, b2_p, *, tile_m, tile_n=256):
    """Fused MLP forward: fc1 -> GELU -> (dropout=id) -> fc2 -> (dropout=id).

    x: (..., hidden) in its native dtype (cast happens in-kernel).
    Weights must come from prepare_params (mlp_dim padded to tile_m multiple,
    cast to the matmul dtype)."""
    orig_shape = x.shape
    hidden = orig_shape[-1]
    m_p = w1_p.shape[1]
    assert w1_p.shape[0] == hidden and w2_p.shape == (m_p, hidden)
    assert m_p % tile_m == 0
    num_m = m_p // tile_m

    x2d = x.reshape(-1, hidden)
    n = x2d.shape[0]
    # Pad the row axis only when tile_n doesn't divide it, so the common case
    # has no extra HBM pad/slice passes over activations.
    n_p = _round_up(n, tile_n)
    if n_p != n:
        x2d = jnp.pad(x2d, ((0, n_p - n), (0, 0)))
    num_rows = n_p // tile_n
    # NOTE(v7x): keep num_rows >= 2 (ideally even) so the "parallel" axis can
    # split evenly across the 2 TensorCores.

    out_dtype = x.dtype
    mm_dtype = w1_p.dtype
    w_item = jnp.dtype(mm_dtype).itemsize
    x_item = jnp.dtype(x.dtype).itemsize
    o_item = jnp.dtype(out_dtype).itemsize

    # --- VMEM budget: request what this kernel needs (+headroom), capped at
    # ~75% of physical per-core VMEM (don't claim all of v7x's 64 MiB). ---
    h_l = _round_up(hidden, 128)      # lane-padded VMEM footprints
    h_s = _round_up(hidden, 8)
    tm_l = _round_up(tile_m, 128)
    need = (
        tile_n * h_l * x_item * 2         # x blocks (double-buffered)
        + tile_n * h_l * o_item * 2       # output blocks
        + h_s * tm_l * w_item * 2         # w1 chunk blocks
        + tile_m * h_l * w_item * 2       # w2 chunk blocks
        + 8 * tm_l * 4 * 2                # b1 blocks
        + 8 * h_l * 4 * 2                 # b2 blocks
        + tile_n * h_l * 4                # f32 accumulator scratch
        + tile_n * h_l * w_item           # bf16 x scratch
        + tile_n * tm_l * 4               # fc1 f32 intermediate (compiler temp)
    )
    try:
        phys = pltpu.get_tpu_info().vmem_capacity_bytes
    except Exception:
        phys = 64 * 1024 * 1024           # conservative default (v7x per-TC)
    cap = int(0.75 * phys)
    vmem_limit = int(min(max(32 * 1024 * 1024, 2 * need + 2 * 1024 * 1024), cap))

    # Advisory cost hint (uses the actual DMA dtypes; weights are re-streamed
    # per row tile only when chunked).
    weight_reads = 1 if num_m == 1 else num_rows
    cost = pl.CostEstimate(
        flops=4 * n * hidden * m_p,
        transcendentals=n * m_p,
        bytes_accessed=n * hidden * x_item
        + n * hidden * o_item
        + weight_reads * (w1_p.size + w2_p.size) * w_item
        + (b1_p.size + b2_p.size) * 4,
    )

    out = pl.pallas_call(
        _mlp_kernel,
        out_shape=jax.ShapeDtypeStruct((n_p, hidden), out_dtype),
        grid_spec=pltpu.PrefetchScalarGridSpec(
            num_scalar_prefetch=0,
            grid=(num_rows, num_m),
            in_specs=[
                # x row tile: constant over the M axis -> fetched once per row
                # tile and stays resident while M chunks stream.
                pl.BlockSpec((tile_n, hidden), lambda i, m: (i, 0)),
                # Weight/bias chunks stream along the M (reduction) axis.
                # With num_m == 1 their index_maps are constant -> fetched
                # once, resident across all row tiles (no re-DMA).
                pl.BlockSpec((hidden, tile_m), lambda i, m: (0, m)),
                pl.BlockSpec((1, tile_m), lambda i, m: (0, m)),
                pl.BlockSpec((tile_m, hidden), lambda i, m: (m, 0)),
                pl.BlockSpec((1, hidden), lambda i, m: (0, 0)),
            ],
            out_specs=pl.BlockSpec((tile_n, hidden), lambda i, m: (i, 0)),
            scratch_shapes=[
                pltpu.VMEM((tile_n, hidden), jnp.float32),   # fc2 accumulator
                pltpu.VMEM((tile_n, hidden), mm_dtype),      # x in matmul dtype
            ],
        ),
        compiler_params=pltpu.CompilerParams(
            dimension_semantics=("parallel", "arbitrary"),
            vmem_limit_bytes=vmem_limit,
        ),
        cost_estimate=cost,
    )(x2d, w1_p, b1_p, w2_p, b2_p)

    if n_p != n:
        out = out[:n]
    return out.reshape(orig_shape)


def init_params(key, hidden_size, mlp_dim):
    """Deterministic init matching the module: xavier_uniform weights,
    normal(std=1e-6) biases.  Weights stored as (in, out)."""
    k1, k2, k3, k4 = jax.random.split(key, 4)
    bound1 = math.sqrt(6.0 / (hidden_size + mlp_dim))
    w1 = jax.random.uniform(k1, (hidden_size, mlp_dim), jnp.float32,
                            -bound1, bound1)
    bound2 = math.sqrt(6.0 / (mlp_dim + hidden_size))
    w2 = jax.random.uniform(k2, (mlp_dim, hidden_size), jnp.float32,
                            -bound2, bound2)
    b1 = 1e-6 * jax.random.normal(k3, (mlp_dim,), jnp.float32)
    b2 = 1e-6 * jax.random.normal(k4, (hidden_size,), jnp.float32)
    return w1, b1, w2, b2


if __name__ == "__main__":
    # Small shapes consistent with the transformer-MLP forward; N = batch*seq
    # spans two 256-row tiles (even tile count), mlp_dim fits residency so the
    # kernel runs in single-chunk (resident-weight) mode.
    batch, seq, hidden_size, mlp_dim = 4, 128, 32, 128

    key = jax.random.PRNGKey(0)
    kx, kp = jax.random.split(key)
    x = jax.random.normal(kx, (batch, seq, hidden_size), jnp.float32)
    w1, b1, w2, b2 = init_params(kp, hidden_size, mlp_dim)

    params, tile_m = prepare_params(w1, b1, w2, b2)
    out = jax.block_until_ready(
        mlp_forward(x, *params, tile_m=tile_m, tile_n=256))

    # Reference in plain JAX using the same bf16-input / f32-accum matmuls.
    x2d = x.reshape(-1, hidden_size).astype(jnp.bfloat16)
    h_ref = jnp.dot(x2d, w1.astype(jnp.bfloat16),
                    preferred_element_type=jnp.float32) + b1
    h_ref = 0.5 * h_ref * (1.0 + jax.lax.erf(h_ref / jnp.sqrt(2.0)))
    ref = jnp.dot(h_ref.astype(jnp.bfloat16), w2.astype(jnp.bfloat16),
                  preferred_element_type=jnp.float32) + b2
    ref = ref.reshape(batch, seq, hidden_size)

    assert out.shape == (batch, seq, hidden_size)
    assert out.dtype == x.dtype
    max_err = float(jnp.max(jnp.abs(out - ref)))
    assert jnp.allclose(out, ref, atol=1e-2, rtol=1e-2), max_err

    print("KERNEL_OK")
</pallas_src>

<mosaic_0001>
module attributes {stable_mosaic.version = 11 : i64} {
  func.func @_mlp_kernel(%arg0: i32, %arg1: i32, %arg2: memref<256x32xf32, #tpu.memory_space<vmem>>, %arg3: memref<32x128xbf16, #tpu.memory_space<vmem>>, %arg4: memref<1x128xf32, #tpu.memory_space<vmem>>, %arg5: memref<128x32xbf16, #tpu.memory_space<vmem>>, %arg6: memref<1x32xf32, #tpu.memory_space<vmem>>, %arg7: memref<256x32xf32, #tpu.memory_space<vmem>>, %arg8: memref<256x32xf32, #tpu.memory_space<vmem>>, %arg9: memref<256x32xbf16, #tpu.memory_space<vmem>>) attributes {dimension_semantics = [#tpu.dimension_semantics<parallel>, #tpu.dimension_semantics<arbitrary>], iteration_bounds = array<i64: 2, 1>, scalar_prefetch = 0 : i64, scratch_operands = 2 : i64, tpu.core_type = #tpu.core_type<tc>, window_params = [{transform_indices = @transform_0, window_bounds = array<i64: 256, 32>}, {transform_indices = @transform_1, window_bounds = array<i64: 32, 128>}, {transform_indices = @transform_2, window_bounds = array<i64: 1, 128>}, {transform_indices = @transform_3, window_bounds = array<i64: 128, 32>}, {pipeline_mode = #tpu.pipeline_mode<synchronous>, transform_indices = @transform_4, window_bounds = array<i64: 1, 32>}, {transform_indices = @transform_5, window_bounds = array<i64: 256, 32>}]} {
    %c0_i32 = arith.constant 0 : i32
    %0 = arith.cmpi eq, %arg1, %c0_i32 : i32
    %1 = arith.extui %0 : i1 to i32
    %c0_i32_0 = arith.constant 0 : i32
    %2 = arith.cmpi ne, %1, %c0_i32_0 : i32
    scf.if %2 {
      %cst_18 = arith.constant 0.000000e+00 : f32
      %26 = vector.broadcast %cst_18 : f32 to vector<256x32xf32>
      %c0_19 = arith.constant 0 : index
      %c0_20 = arith.constant 0 : index
      %27 = vector.load %arg8[%c0_19, %c0_20] : memref<256x32xf32, #tpu.memory_space<vmem>>, vector<256x32xf32>
      tpu.vector_store %arg8[%c0_19, %c0_20], %26 {strides = array<i32>} : memref<256x32xf32, #tpu.memory_space<vmem>>, vector<256x32xf32>,
      %c0_21 = arith.constant 0 : index
      %c0_22 = arith.constant 0 : index
      %28 = vector.load %arg2[%c0_21, %c0_22] : memref<256x32xf32, #tpu.memory_space<vmem>>, vector<256x32xf32>
      %29 = arith.truncf %28 : vector<256x32xf32> to vector<256x32xbf16>
      %c0_23 = arith.constant 0 : index
      %c0_24 = arith.constant 0 : index
      %30 = vector.load %arg9[%c0_23, %c0_24] : memref<256x32xbf16, #tpu.memory_space<vmem>>, vector<256x32xbf16>
      tpu.vector_store %arg9[%c0_23, %c0_24], %29 {strides = array<i32>} : memref<256x32xbf16, #tpu.memory_space<vmem>>, vector<256x32xbf16>,
    } else {
    }
    %c0 = arith.constant 0 : index
    %c0_1 = arith.constant 0 : index
    %3 = vector.load %arg9[%c0, %c0_1] : memref<256x32xbf16, #tpu.memory_space<vmem>>, vector<256x32xbf16>
    %c0_2 = arith.constant 0 : index
    %c0_3 = arith.constant 0 : index
    %4 = vector.load %arg3[%c0_2, %c0_3] : memref<32x128xbf16, #tpu.memory_space<vmem>>, vector<32x128xbf16>
    %cst = arith.constant dense<0.000000e+00> : vector<256x128xf32>
    %5 = tpu.matmul %3, %4, %cst {dimension_numbers = #tpu.dot_dimension_numbers<[1], [0], [0], [1], [0, 0, 1, 1], [], []>} : vector<256x32xbf16>, vector<32x128xbf16>, vector<256x128xf32> -> vector<256x128xf32>
    %c0_4 = arith.constant 0 : index
    %c0_5 = arith.constant 0 : index
    %6 = vector.load %arg4[%c0_4, %c0_5] : memref<1x128xf32, #tpu.memory_space<vmem>>, vector<1x128xf32>
    %7 = vector.broadcast %6 : vector<1x128xf32> to vector<256x128xf32>
    %8 = arith.addf %5, %7 : vector<256x128xf32>
    %cst_6 = arith.constant 5.000000e-01 : f32
    %9 = vector.broadcast %cst_6 : f32 to vector<256x128xf32>
    %10 = arith.mulf %9, %8 : vector<256x128xf32>
    %cst_7 = arith.constant 0.707106769 : f32
    %11 = vector.broadcast %cst_7 : f32 to vector<256x128xf32>
    %12 = arith.mulf %8, %11 : vector<256x128xf32>
    %13 = math.erf %12 : vector<256x128xf32>
    %cst_8 = arith.constant 1.000000e+00 : f32
    %14 = vector.broadcast %cst_8 : f32 to vector<256x128xf32>
    %15 = arith.addf %14, %13 : vector<256x128xf32>
    %16 = arith.mulf %10, %15 : vector<256x128xf32>
    %c0_9 = arith.constant 0 : index
    %c0_10 = arith.constant 0 : index
    %17 = vector.load %arg8[%c0_9, %c0_10] : memref<256x32xf32, #tpu.memory_space<vmem>>, vector<256x32xf32>
    %18 = arith.truncf %16 : vector<256x128xf32> to vector<256x128xbf16>
    %c0_11 = arith.constant 0 : index
    %c0_12 = arith.constant 0 : index
    %19 = vector.load %arg5[%c0_11, %c0_12] : memref<128x32xbf16, #tpu.memory_space<vmem>>, vector<128x32xbf16>
    %cst_13 = arith.constant dense<0.000000e+00> : vector<256x32xf32>
    %20 = tpu.matmul %18, %19, %cst_13 {dimension_numbers = #tpu.dot_dimension_numbers<[1], [0], [0], [1], [0, 0, 1, 1], [], []>} : vector<256x128xbf16>, vector<128x32xbf16>, vector<256x32xf32> -> vector<256x32xf32>
    %21 = arith.addf %17, %20 : vector<256x32xf32>
    %c0_14 = arith.constant 0 : index
    %c0_15 = arith.constant 0 : index
    %22 = vector.load %arg8[%c0_14, %c0_15] : memref<256x32xf32, #tpu.memory_space<vmem>>, vector<256x32xf32>
    tpu.vector_store %arg8[%c0_14, %c0_15], %21 {strides = array<i32>} : memref<256x32xf32, #tpu.memory_space<vmem>>, vector<256x32xf32>,
    %c0_i32_16 = arith.constant 0 : i32
    %23 = arith.cmpi eq, %arg1, %c0_i32_16 : i32
    %24 = arith.extui %23 : i1 to i32
    %c0_i32_17 = arith.constant 0 : i32
    %25 = arith.cmpi ne, %24, %c0_i32_17 : i32
    scf.if %25 {
      %c0_18 = arith.constant 0 : index
      %c0_19 = arith.constant 0 : index
      %26 = vector.load %arg8[%c0_18, %c0_19] : memref<256x32xf32, #tpu.memory_space<vmem>>, vector<256x32xf32>
      %c0_20 = arith.constant 0 : index
      %c0_21 = arith.constant 0 : index
      %27 = vector.load %arg6[%c0_20, %c0_21] : memref<1x32xf32, #tpu.memory_space<vmem>>, vector<1x32xf32>
      %28 = vector.broadcast %27 : vector<1x32xf32> to vector<256x32xf32>
      %29 = arith.addf %26, %28 : vector<256x32xf32>
      %c0_22 = arith.constant 0 : index
      %c0_23 = arith.constant 0 : index
      %30 = vector.load %arg7[%c0_22, %c0_23] : memref<256x32xf32, #tpu.memory_space<vmem>>, vector<256x32xf32>
      tpu.vector_store %arg7[%c0_22, %c0_23], %29 {strides = array<i32>} : memref<256x32xf32, #tpu.memory_space<vmem>>, vector<256x32xf32>,
    } else {
    }
    return
  }
  func.func @transform_0(%arg0: i32, %arg1: i32) -> (i32, i32) {
    %c0_i32 = arith.constant 0 : i32
    %c0_i32_0 = arith.constant 0 : i32
    return %arg0, %c0_i32 : i32, i32
  }
  func.func @transform_1(%arg0: i32, %arg1: i32) -> (i32, i32) {
    %c0_i32 = arith.constant 0 : i32
    %c0_i32_0 = arith.constant 0 : i32
    return %c0_i32, %arg1 : i32, i32
  }
  func.func @transform_2(%arg0: i32, %arg1: i32) -> (i32, i32) {
    %c0_i32 = arith.constant 0 : i32
    %c0_i32_0 = arith.constant 0 : i32
    return %c0_i32, %arg1 : i32, i32
  }
  func.func @transform_3(%arg0: i32, %arg1: i32) -> (i32, i32) {
    %c0_i32 = arith.constant 0 : i32
    %c0_i32_0 = arith.constant 0 : i32
    return %arg1, %c0_i32 : i32, i32
  }
  func.func @transform_4(%arg0: i32, %arg1: i32) -> (i32, i32) {
    %c0_i32 = arith.constant 0 : i32
    %c0_i32_0 = arith.constant 0 : i32
    %c0_i32_1 = arith.constant 0 : i32
    return %c0_i32, %c0_i32_0 : i32, i32
  }
  func.func @transform_5(%arg0: i32, %arg1: i32) -> (i32, i32) {
    %c0_i32 = arith.constant 0 : i32
    %c0_i32_0 = arith.constant 0 : i32
    return %arg0, %c0_i32 : i32, i32
  }
}

</mosaic_0001>

<bundles_post_ra>
// kernel: tpu_custom_call.1
= control target key start
LH: loop header
LB: loop body
LE: loop exit
PB: predicated region body
PF: predicated region fallthrough
CT: control target
= control target key end

     0   :  { %s1692_s18 = smov 0   ;;  %s1694_s19 = smov 0   ;;  %s2104_s0 = inlined_call_operand.vmem [shape: f32[512,32], index: 0, kind: input, shape index: {}]   ;;  %s2105_s1 = inlined_call_operand.vmem [shape: bf16[32,128], index: 1, kind: input, shape index: {}]   ;;  %s2106_s2 = inlined_call_operand.vmem [shape: f32[1,128], index: 2, kind: input, shape index: {}]   ;;  %s2107_s3 = inlined_call_operand.vmem [shape: bf16[128,32], index: 3, kind: input, shape index: {}]   ;;  %s2108_s4 = inlined_call_operand.vmem [shape: f32[1,32], index: 4, kind: input, shape index: {}]   ;;  %s2109_s5 = inlined_call_operand.vmem [shape: f32[512,32], index: 5, kind: output, shape index: {}]  }
   0x1   :  { %s1696_s20 = smov 0  }
   0x2 LB: > { %s27_s21 = sadd.s32 1, %s1655_s19  ;;  %p1361_p0 = scmp.ge.s32.totalorder %s1659_s20, 1  ;;  %s1659_s20 = sphi %s1696_s20, %s15_s20   ;;  %s1655_s19 = sphi %s1694_s19, %s2111_s19   ;;  %s1651_s18 = sphi %s1692_s18, %s2110_s18  }
   0x3   : > { %p29_p1 = scmp.ge.s32.totalorder %s27_s21, 2  ;;  %p228_p2 = scmp.lt.s32.totalorder %s1659_s20, 3 }
   0x5   : > { %s2113_s21 = smov (%p29_p1, %s27_s21), 0  ;;  %p229_p3 = pnand %p1361_p0, %p228_p2 }
   0x6   : > { %v1563_v0 = vld [vmem:[%s2105_s1] sm:$0xff] (!%p229_p3)   ;;  %s1362_s24 = sshll.u32 (!%p229_p3), %s1651_s18, 5  ;;  %v1564_v1 = vld [vmem:[%s2105_s1 + $0x8] sm:$0xff] (!%p229_p3)   ;;  %vm298_vm0 = vcmask (!%p229_p3), 261120  }
   0x7   : > { %232 = sbr.rel (%p229_p3) target bundleno = 551 (0x227), region = 40  ;;  %p269_p4 = scmp.lt.s32.totalorder (!%p229_p3), %s1362_s24, 63  ;;  %1438 = vmatprep.subr.bf16.mxu0 (!%p229_p3), %v1563_v0  ;;  %v1719_v2 = vld [vmem:[%s2107_s3] sm:$0xff] (!%p229_p3)   ;;  %v1726_v3 = vld [vmem:[%s2107_s3 + $0x8] sm:$0xff] (!%p229_p3)  }
   0x8   : > { %1439 = vmatpush3.bf16.msra.mxu0 (!%p229_p3), %v1563_v0  ;;  %1522 = vmatprep.subr.bf16.mxu1 (!%p229_p3), %v1719_v2 }
   0x9   : > { %1440 = vmatprep.subr.bf16.mxu0 (!%p229_p3), %v1564_v1  ;;  %1530 = vmatpush3.bf16.msra.mxu1 (!%p229_p3), %v1719_v2 }
   0xa   : > { %1523 = vmatprep.subr.bf16.mxu1 (!%p229_p3), %v1726_v3 }
   0xc   : > { %1441 = vmatpush3.bf16.msra.mxu0 (!%p229_p3), %v1564_v1 }
   0xd   : > { %1474 = vmatprep.subr.bf16.mxu0 (!%p229_p3), %v1719_v2  ;;  %1531 = vmatpush3.bf16.msra.mxu1 (!%p229_p3), %v1726_v3 }
   0xe   : > { %s2115_s24 = smov (!%p269_p4, %s1362_s24), 63 }
   0xf   : > { %s1363_s6 = sshll.u32 %s2115_s24, 3 }
  0x10   : > { %s1736_s9 = scalar_lea.vmem %s2104_s0, %s1363_s6  ;;  %s1969_s8 = scalar_lea.vmem %s2109_s5, %s1363_s6 }
  0x11   : > { %v331_v4 = vld [vmem:[%s1736_s9] sm:$0xff]  ;;  %v332_v5 = vld [vmem:[%s1736_s9 + $0x8] sm:$0xff]  ;;  %v333_v6 = vld [vmem:[%s1736_s9 + $0x10] sm:$0xff] }
  0x12   : > { %v363_v7 = vpack.c.bf16 %v332_v5, %v331_v4  ;;  %v334_v8 = vld [vmem:[%s1736_s9 + $0x18] sm:$0xff]  ;;  %v335_v9 = vld [vmem:[%s1736_s9 + $0x20] sm:$0xff]  ;;  %v336_v10 = vld [vmem:[%s1736_s9 + $0x28] sm:$0xff] }
  0x13   : > { %v364_v11 = vpack.c.bf16 %v334_v8, %v333_v6  ;;  %v365_v12 = vpack.c.bf16 %v336_v10, %v335_v9  ;;  %v337_v13 = vld [vmem:[%s1736_s9 + $0x30] sm:$0xff]  ;;  %v338_v14 = vld [vmem:[%s1736_s9 + $0x38] sm:$0xff]  ;;  %v339_v15 = vld [vmem:[%s1736_s9 + $0x40] sm:$0xff]  ;;  %v1661_v10 = vmov 0.0  }
  0x14   : > { %379 = vst.msk [vmem:[#allocation3] sm:$0xff] %vm298_vm0, %v363_v7  ;;  %v366_v16 = vpack.c.bf16 %v338_v14, %v337_v13  ;;  %v340_v17 = vld [vmem:[%s1736_s9 + $0x48] sm:$0xff]  ;;  %v341_v18 = vld [vmem:[%s1736_s9 + $0x50] sm:$0xff]  ;;  %v342_v19 = vld [vmem:[%s1736_s9 + $0x58] sm:$0xff] }
  0x15   : > { %380 = vst.msk [vmem:[#allocation3 + $0x8] sm:$0xff] %vm298_vm0, %v364_v11  ;;  %381 = vst.msk [vmem:[#allocation3 + $0x10] sm:$0xff] %vm298_vm0, %v365_v12  ;;  %v367_v20 = vpack.c.bf16 %v340_v17, %v339_v15  ;;  %v368_v21 = vpack.c.bf16 %v342_v19, %v341_v18  ;;  %v343_v22 = vld [vmem:[%s1736_s9 + $0x60] sm:$0xff]  ;;  %v344_v23 = vld [vmem:[%s1736_s9 + $0x68] sm:$0xff] }
  0x16   : > { %v345_v24 = vld [vmem:[%s1736_s9 + $0x70] sm:$0xff]  ;;  %382 = vst.msk [vmem:[#allocation3 + $0x18] sm:$0xff] %vm298_vm0, %v366_v16  ;;  %v369_v25 = vpack.c.bf16 %v344_v23, %v343_v22  ;;  %v346_v26 = vld [vmem:[%s1736_s9 + $0x78] sm:$0xff]  ;;  %v347_v27 = vld [vmem:[%s1736_s9 + $0x80] sm:$0xff] }
  0x17   : > { %v348_v28 = vld [vmem:[%s1736_s9 + $0x88] sm:$0xff]  ;;  %383 = vst.msk [vmem:[#allocation3 + $0x20] sm:$0xff] %vm298_vm0, %v367_v20  ;;  %384 = vst.msk [vmem:[#allocation3 + $0x28] sm:$0xff] %vm298_vm0, %v368_v21  ;;  %v370_v29 = vpack.c.bf16 %v346_v26, %v345_v24  ;;  %v349_v31 = vld [vmem:[%s1736_s9 + $0x90] sm:$0xff] }
  0x18   : > { %v371_v30 = vpack.c.bf16 %v348_v28, %v347_v27  ;;  %v350_v32 = vld [vmem:[%s1736_s9 + $0x98] sm:$0xff]  ;;  %v351_v33 = vld [vmem:[%s1736_s9 + $0xa0] sm:$0xff]  ;;  %385 = vst.msk [vmem:[#allocation3 + $0x30] sm:$0xff] %vm298_vm0, %v369_v25  ;;  %v352_v35 = vld [vmem:[%s1736_s9 + $0xa8] sm:$0xff] }
  0x19   : > { %v372_v34 = vpack.c.bf16 %v350_v32, %v349_v31  ;;  %v353_v36 = vld [vmem:[%s1736_s9 + $0xb0] sm:$0xff]  ;;  %v354_v37 = vld [vmem:[%s1736_s9 + $0xb8] sm:$0xff]  ;;  %386 = vst.msk [vmem:[#allocation3 + $0x38] sm:$0xff] %vm298_vm0, %v370_v29  ;;  %v373_v38 = vpack.c.bf16 %v352_v35, %v351_v33  ;;  %v355_v40 = vld [vmem:[%s1736_s9 + $0xc0] sm:$0xff] }
  0x1a   : > { %387 = vst.msk [vmem:[#allocation3 + $0x40] sm:$0xff] %vm298_vm0, %v371_v30  ;;  %v374_v39 = vpack.c.bf16 %v354_v37, %v353_v36  ;;  %v356_v41 = vld [vmem:[%s1736_s9 + $0xc8] sm:$0xff]  ;;  %v357_v42 = vld [vmem:[%s1736_s9 + $0xd0] sm:$0xff]  ;;  %v358_v44 = vld [vmem:[%s1736_s9 + $0xd8] sm:$0xff] }
  0x1b   : > { %388 = vst.msk [vmem:[#allocation3 + $0x48] sm:$0xff] %vm298_vm0, %v372_v34  ;;  %v375_v43 = vpack.c.bf16 %v356_v41, %v355_v40  ;;  %v359_v45 = vld [vmem:[%s1736_s9 + $0xe0] sm:$0xff]  ;;  %v360_v46 = vld [vmem:[%s1736_s9 + $0xe8] sm:$0xff]  ;;  %389 = vst.msk [vmem:[#allocation3 + $0x50] sm:$0xff] %vm298_vm0, %v373_v38  ;;  %v376_v48 = vpack.c.bf16 %v358_v44, %v357_v42 }
  0x1c   : > { %v395_v47 = vld [vmem:[#allocation3] sm:$0xff]  ;;  %390 = vst.msk [vmem:[#allocation3 + $0x58] sm:$0xff] %vm298_vm0, %v374_v39  ;;  %v377_v49 = vpack.c.bf16 %v360_v46, %v359_v45  ;;  %v361_v50 = vld [vmem:[%s1736_s9 + $0xf0] sm:$0xff]  ;;  %v362_v51 = vld [vmem:[%s1736_s9 + $0xf8] sm:$0xff] }
  0x1d   : > { %1442 = vmatprep.mubr.msk.bf16.mxu0 %vm298_vm0, %v395_v47  ;;  %v396_v52 = vld [vmem:[#allocation3 + $0x8] sm:$0xff]  ;;  %v397_v53 = vld [vmem:[#allocation3 + $0x10] sm:$0xff]  ;;  %391 = vst.msk [vmem:[#allocation3 + $0x60] sm:$0xff] %vm298_vm0, %v375_v43  ;;  %v378_v54 = vpack.c.bf16 %v362_v51, %v361_v50  ;;  %392 = vst.msk [vmem:[#allocation3 + $0x68] sm:$0xff] %vm298_vm0, %v376_v48 }
  0x1e   : > { %1443 = vmatmul.mubr.msk.bf16.vlgmr.msra.gmra.mrb[0].mxu0 %vm298_vm0, %v396_v52  ;;  %393 = vst.msk [vmem:[#allocation3 + $0x70] sm:$0xff] %vm298_vm0, %v377_v49  ;;  %v398_v55 = vld [vmem:[#allocation3 + $0x18] sm:$0xff]  ;;  %v399_v56 = vld [vmem:[#allocation3 + $0x20] sm:$0xff]  ;;  %v400_v57 = vld [vmem:[#allocation3 + $0x28] sm:$0xff] }
  0x1f   : > { %1446 = vmatprep.mubr.msk.bf16.mxu0 %vm298_vm0, %v397_v53  ;;  %394 = vst.msk [vmem:[#allocation3 + $0x78] sm:$0xff] %vm298_vm0, %v378_v54  ;;  %1475 = vmatpush3.bf16.msra.mxu0 %v1719_v2  ;;  %v401_v58 = vld [vmem:[#allocation3 + $0x30] sm:$0xff]  ;;  %v1568_v5 = vld [vmem:[%s2107_s3 + $0x18] sm:$0xff]   ;;  %v1569_v6 = vld [vmem:[%s2107_s3 + $0x20] sm:$0xff]  }
  0x20   : > { %1476 = vmatprep.subr.bf16.mxu0 %v1726_v3  ;;  %v402_v59 = vld [vmem:[#allocation3 + $0x38] sm:$0xff]  ;;  %v1567_v4 = vld [vmem:[%s2107_s3 + $0x10] sm:$0xff]   ;;  %v1570_v7 = vld [vmem:[%s2107_s3 + $0x28] sm:$0xff]   ;;  %301 = vst.msk [vmem:[#allocation2 + $0x10] sm:$0xff] %vm298_vm0, %v1661_v10 }
  0x21   : > { %v403_v60 = vld [vmem:[#allocation3 + $0x40] sm:$0xff]  ;;  %1524 = vmatprep.subr.bf16.mxu1 %v1567_v4  ;;  %v1571_v8 = vld [vmem:[%s2107_s3 + $0x30] sm:$0xff]   ;;  %v1572_v9 = vld [vmem:[%s2107_s3 + $0x38] sm:$0xff]   ;;  %299 = vst.msk [vmem:[#allocation2] sm:$0xff] %vm298_vm0, %v1661_v10 }
  0x22   : > { %v404_v61 = vld [vmem:[#allocation3 + $0x48] sm:$0xff]  ;;  %v405_v62 = vld [vmem:[#allocation3 + $0x50] sm:$0xff]  ;;  %1532 = vmatpush3.bf16.msra.mxu1 %v1567_v4  ;;  %300 = vst.msk [vmem:[#allocation2 + $0x8] sm:$0xff] %vm298_vm0, %v1661_v10  ;;  %302 = vst.msk [vmem:[#allocation2 + $0x18] sm:$0xff] %vm298_vm0, %v1661_v10 }
  0x23   : > { %1477 = vmatpush3.bf16.msra.mxu0 %v1726_v3  ;;  %v406_v63 = vld [vmem:[#allocation3 + $0x58] sm:$0xff]  ;;  %1525 = vmatprep.subr.bf16.mxu1 %v1568_v5  ;;  %303 = vst.msk [vmem:[#allocation2 + $0x20] sm:$0xff] %vm298_vm0, %v1661_v10  ;;  %304 = vst.msk [vmem:[#allocation2 + $0x28] sm:$0xff] %vm298_vm0, %v1661_v10  ;;  %v1861_v11 = vld [vmem:[%s2106_s2] ss:$0 sm:$0xff] }
  0x24   : > { %v407_v0 = vld [vmem:[#allocation3 + $0x60] sm:$0xff]  ;;  %v408_v1 = vld [vmem:[#allocation3 + $0x68] sm:$0xff]  ;;  %1478 = vmatprep.subr.bf16.mxu0 %v1567_v4  ;;  %305 = vst.msk [vmem:[#allocation2 + $0x30] sm:$0xff] %vm298_vm0, %v1661_v10  ;;  %306 = vst.msk [vmem:[#allocation2 + $0x38] sm:$0xff] %vm298_vm0, %v1661_v10 }
  0x25   : > { %v409_v2 = vld [vmem:[#allocation3 + $0x70] sm:$0xff]  ;;  %307 = vst.msk [vmem:[#allocation2 + $0x40] sm:$0xff] %vm298_vm0, %v1661_v10  ;;  %308 = vst.msk [vmem:[#allocation2 + $0x48] sm:$0xff] %vm298_vm0, %v1661_v10 }
  0x26   : > { %1447 = vmatmul.mubr.msk.bf16.gmra.mrb[4].mxu0 %vm298_vm0, %v398_v55  ;;  %v410_v3 = vld [vmem:[#allocation3 + $0x78] sm:$0xff]  ;;  %1533 = vmatpush3.bf16.msra.mxu1 %v1568_v5  ;;  %309 = vst.msk [vmem:[#allocation2 + $0x50] sm:$0xff] %vm298_vm0, %v1661_v10  ;;  %310 = vst.msk [vmem:[#allocation2 + $0x58] sm:$0xff] %vm298_vm0, %v1661_v10 }
  0x27   : > { %1450 = vmatprep.mubr.msk.bf16.mxu0 %vm298_vm0, %v399_v56  ;;  %1479 = vmatpush3.bf16.msra.mxu0 %v1567_v4  ;;  %311 = vst.msk [vmem:[#allocation2 + $0x60] sm:$0xff] %vm298_vm0, %v1661_v10  ;;  %312 = vst.msk [vmem:[#allocation2 + $0x68] sm:$0xff] %vm298_vm0, %v1661_v10 }
  0x28   : > { %1480 = vmatprep.subr.bf16.mxu0 %v1568_v5  ;;  %1526 = vmatprep.subr.bf16.mxu1 %v1569_v6  ;;  %313 = vst.msk [vmem:[#allocation2 + $0x70] sm:$0xff] %vm298_vm0, %v1661_v10  ;;  %314 = vst.msk [vmem:[#allocation2 + $0x78] sm:$0xff] %vm298_vm0, %v1661_v10 }
  0x29   : > { %315 = vst.msk [vmem:[#allocation2 + $0x80] sm:$0xff] %vm298_vm0, %v1661_v10  ;;  %316 = vst.msk [vmem:[#allocation2 + $0x88] sm:$0xff] %vm298_vm0, %v1661_v10 }
  0x2a   : > { %1534 = vmatpush3.bf16.msra.mxu1 %v1569_v6  ;;  %317 = vst.msk [vmem:[#allocation2 + $0x90] sm:$0xff] %vm298_vm0, %v1661_v10  ;;  %318 = vst.msk [vmem:[#allocation2 + $0x98] sm:$0xff] %vm298_vm0, %v1661_v10 }
  0x2b   : > { %1481 = vmatpush3.bf16.msra.mxu0 %v1568_v5  ;;  %1527 = vmatprep.subr.bf16.mxu1 %v1570_v7  ;;  %319 = vst.msk [vmem:[#allocation2 + $0xa0] sm:$0xff] %vm298_vm0, %v1661_v10  ;;  %320 = vst.msk [vmem:[#allocation2 + $0xa8] sm:$0xff] %vm298_vm0, %v1661_v10 }
  0x2c   : > { %1482 = vmatprep.subr.bf16.mxu0 %v1569_v6  ;;  %321 = vst.msk [vmem:[#allocation2 + $0xb0] sm:$0xff] %vm298_vm0, %v1661_v10  ;;  %322 = vst.msk [vmem:[#allocation2 + $0xb8] sm:$0xff] %vm298_vm0, %v1661_v10 }
  0x2d   : > { %323 = vst.msk [vmem:[#allocation2 + $0xc0] sm:$0xff] %vm298_vm0, %v1661_v10  ;;  %324 = vst.msk [vmem:[#allocation2 + $0xc8] sm:$0xff] %vm298_vm0, %v1661_v10 }
  0x2e   : > { %1451 = vmatmul.mubr.msk.bf16.gmra.mrb[8].mxu0 %vm298_vm0, %v400_v57  ;;  %1535 = vmatpush3.bf16.msra.mxu1 %v1570_v7  ;;  %325 = vst.msk [vmem:[#allocation2 + $0xd0] sm:$0xff] %vm298_vm0, %v1661_v10  ;;  %326 = vst.msk [vmem:[#allocation2 + $0xd8] sm:$0xff] %vm298_vm0, %v1661_v10 }
  0x2f   : > { %1454 = vmatprep.mubr.msk.bf16.mxu0 %vm298_vm0, %v401_v58  ;;  %1483 = vmatpush3.bf16.msra.mxu0 %v1569_v6  ;;  %327 = vst.msk [vmem:[#allocation2 + $0xe0] sm:$0xff] %vm298_vm0, %v1661_v10  ;;  %328 = vst.msk [vmem:[#allocation2 + $0xe8] sm:$0xff] %vm298_vm0, %v1661_v10 }
  0x30   : > { %1484 = vmatprep.subr.bf16.mxu0 %v1570_v7  ;;  %1528 = vmatprep.subr.bf16.mxu1 %v1571_v8  ;;  %329 = vst.msk [vmem:[#allocation2 + $0xf0] sm:$0xff] %vm298_vm0, %v1661_v10  ;;  %330 = vst.msk [vmem:[#allocation2 + $0xf8] sm:$0xff] %vm298_vm0, %v1661_v10 }
  0x32   : > { %1536 = vmatpush3.bf16.msra.mxu1 %v1571_v8 }
  0x33   : > { %1485 = vmatpush3.bf16.msra.mxu0 %v1570_v7  ;;  %1529 = vmatprep.subr.bf16.mxu1 %v1572_v9 }
  0x34   : > { %1486 = vmatprep.subr.bf16.mxu0 %v1571_v8 }
  0x36   : > { %1455 = vmatmul.mubr.msk.bf16.gmra.mrb[12].mxu0 %vm298_vm0, %v402_v59  ;;  %1537 = vmatpush3.bf16.msra.mxu1 %v1572_v9 }
  0x37   : > { %1458 = vmatprep.mubr.msk.bf16.mxu0 %vm298_vm0, %v403_v60  ;;  %1487 = vmatpush3.bf16.msra.mxu0 %v1571_v8 }
  0x38   : > { %1488 = vmatprep.subr.bf16.mxu0 %v1572_v9 }
  0x3b   : > { %1489 = vmatpush3.bf16.msra.mxu0 %v1572_v9 }
  0x3e   : > { %1459 = vmatmul.mubr.msk.bf16.gmra.mrb[16].mxu0 %vm298_vm0, %v404_v61 }
  0x3f   : > { %1462 = vmatprep.mubr.msk.bf16.mxu0 %vm298_vm0, %v405_v62 }
  0x46   : > { %1463 = vmatmul.mubr.msk.bf16.gmra.mrb[20].mxu0 %vm298_vm0, %v406_v63 }
  0x47   : > { %1466 = vmatprep.mubr.msk.bf16.mxu0 %vm298_vm0, %v407_v0 }
  0x4e   : > { %1467 = vmatmul.mubr.msk.bf16.gmra.mrb[24].mxu0 %vm298_vm0, %v408_v1 }
  0x4f   : > { %1470 = vmatprep.mubr.msk.bf16.mxu0 %vm298_vm0, %v409_v2 }
  0x56   : > { %1471 = vmatmul.mubr.msk.bf16.gmra.mrb[28].mxu0 %vm298_vm0, %v410_v3 }
  0xf1   : > { %v1444_v12 = vpop.f32.mrb[0].mxu0 }
  0xf2   : > { %v526_v13 = vadd.f32 %v1444_v12, %v1861_v11  ;;  %v517_v14 = vpop.f32.mrb[1].mxu0 }
  0xf3   : > { %v518_v15 = vadd.f32 %v1861_v11, %v517_v14  ;;  %v1445_v16 = vpop.f32.mrb[2].mxu0 }
  0xf4   : > { %v678_v17 = vmul.f32 0.70710677, %v526_v13  ;;  %v529_v18 = vadd.f32 %v1445_v16, %v1861_v11  ;;  %v520_v19 = vpop.f32.mrb[3].mxu0  ;;  %v646_v45 = vmul.f32 0.5, %v526_v13 }
  0xf5   : > { %v676_v20 = vmul.f32 0.70710677, %v518_v15  ;;  %v521_v21 = vadd.f32 %v1861_v11, %v520_v19  ;;  %v644_v50 = vmul.f32 0.5, %v518_v15 }
  0xf6   : > { %1573 = verf.f32 %v678_v17  ;;  %v679_v22 = vmul.f32 0.70710677, %v529_v18  ;;  %v647_v46 = vmul.f32 0.5, %v529_v18 }
  0xf7   : > { %1575 = verf.f32 %v676_v20  ;;  %v677_v23 = vmul.f32 0.70710677, %v521_v21  ;;  %v645_v51 = vmul.f32 0.5, %v521_v21 }
  0xf8   : > { %1577 = verf.f32 %v679_v22 }
  0xf9   : > { %1579 = verf.f32 %v677_v23  ;;  %v1448_v24 = vpop.f32.mrb[4].mxu0 }
  0xfa   : > { %v542_v25 = vadd.f32 %v1448_v24, %v1861_v11  ;;  %v533_v26 = vpop.f32.mrb[5].mxu0 }
  0xfb   : > { %v534_v27 = vadd.f32 %v1861_v11, %v533_v26  ;;  %v1449_v28 = vpop.f32.mrb[6].mxu0 }
  0xfc   : > { %v682_v29 = vmul.f32 0.70710677, %v542_v25  ;;  %v545_v30 = vadd.f32 %v1449_v28, %v1861_v11  ;;  %v536_v31 = vpop.f32.mrb[7].mxu0  ;;  %v650_v6 = vmul.f32 0.5, %v542_v25 }
  0xfd   : > { %v680_v32 = vmul.f32 0.70710677, %v534_v27  ;;  %v1871_v33 = vadd.f32 %v1861_v11, %v536_v31  ;;  %v648_v17 = vmul.f32 0.5, %v534_v27 }
  0xfe   : > { %1581 = verf.f32 %v682_v29  ;;  %v683_v34 = vmul.f32 0.70710677, %v545_v30  ;;  %v651_v12 = vmul.f32 0.5, %v545_v30 }
  0xff   : > { %1583 = verf.f32 %v680_v32  ;;  %v681_v35 = vmul.f32 0.70710677, %v1871_v33  ;;  %v649_v23 = vmul.f32 0.5, %v1871_v33 }
 0x100   : > { %v1574_v36 = vpop.eup %1573  ;;  %1585 = verf.f32 %v683_v34 }
 0x101   : > { %v1576_v37 = vpop.eup %1575  ;;  %v742_v38 = vadd.f32 1.0, %v1574_v36  ;;  %1587 = verf.f32 %v681_v35  ;;  %v1452_v39 = vpop.f32.mrb[8].mxu0 }
 0x102   : > { %v1578_v40 = vpop.eup %1577  ;;  %v740_v41 = vadd.f32 1.0, %v1576_v37  ;;  %v1875_v42 = vadd.f32 %v1452_v39, %v1861_v11  ;;  %v549_v43 = vpop.f32.mrb[9].mxu0 }
 0x103   : > { %v1580_v44 = vpop.eup %1579  ;;  %v743_v47 = vadd.f32 1.0, %v1578_v40  ;;  %v1878_v48 = vadd.f32 %v1861_v11, %v549_v43  ;;  %v1453_v49 = vpop.f32.mrb[10].mxu0  ;;  %v774_v55 = vmul.f32 %v742_v38, %v646_v45 }
 0x104   : > { %v741_v52 = vadd.f32 1.0, %v1580_v44  ;;  %v686_v53 = vmul.f32 0.70710677, %v1875_v42  ;;  %v552_v54 = vpop.f32.mrb[11].mxu0  ;;  %v561_v58 = vadd.f32 %v1453_v49, %v1861_v11  ;;  %v772_v59 = vmul.f32 %v740_v41, %v644_v50 }
 0x105   : > { %v775_v56 = vmul.f32 %v743_v47, %v647_v46  ;;  %v684_v57 = vmul.f32 0.70710677, %v1878_v48  ;;  %v553_v61 = vadd.f32 %v1861_v11, %v552_v54  ;;  %v654_v40 = vmul.f32 0.5, %v1875_v42 }
 0x106   : > { %v773_v60 = vmul.f32 %v741_v52, %v645_v51  ;;  %1589 = verf.f32 %v686_v53  ;;  %v687_v63 = vmul.f32 0.70710677, %v561_v58  ;;  %v652_v46 = vmul.f32 0.5, %v1878_v48 }
 0x107   : > { %v837_v62 = vpack.c.bf16 %v775_v56, %v774_v55  ;;  %1591 = verf.f32 %v684_v57  ;;  %v685_v1 = vmul.f32 0.70710677, %v553_v61  ;;  %v655_v47 = vmul.f32 0.5, %v561_v58 }
 0x108   : > { %v1582_v0 = vpop.eup %1581  ;;  %v836_v2 = vpack.c.bf16 %v773_v60, %v772_v59  ;;  %1593 = verf.f32 %v687_v63  ;;  %v653_v52 = vmul.f32 0.5, %v553_v61 }
 0x109   : > { %v1584_v3 = vpop.eup %1583  ;;  %v1456_v4 = vpop.f32.mrb[12].mxu0  ;;  %v746_v7 = vadd.f32 1.0, %v1582_v0  ;;  %1595 = verf.f32 %v685_v1 }
 0x10a   : > { %v1586_v5 = vpop.eup %1585  ;;  %v1885_v8 = vadd.f32 %v1456_v4, %v1861_v11  ;;  %v565_v9 = vpop.f32.mrb[13].mxu0  ;;  %1490 = vmatprep.mubr.bf16.mxu0 %v836_v2  ;;  %v744_v16 = vadd.f32 1.0, %v1584_v3 }
 0x10b   : > { %v1588_v10 = vpop.eup %1587  ;;  %v747_v13 = vadd.f32 1.0, %v1586_v5  ;;  %v1888_v14 = vadd.f32 %v1861_v11, %v565_v9  ;;  %v1457_v15 = vpop.f32.mrb[14].mxu0  ;;  %1491 = vmatmul.mubr.bf16.vlgmr.msra.gmra.mrb[32].mxu0 %v837_v62  ;;  %v778_v26 = vmul.f32 %v746_v7, %v650_v6 }
 0x10c   : > { %v690_v18 = vmul.f32 0.70710677, %v1885_v8  ;;  %v1892_v19 = vadd.f32 %v1457_v15, %v1861_v11  ;;  %v568_v20 = vpop.f32.mrb[15].mxu0  ;;  %v745_v21 = vadd.f32 1.0, %v1588_v10  ;;  %v776_v29 = vmul.f32 %v744_v16, %v648_v17 }
 0x10d   : > { %v779_v22 = vmul.f32 %v747_v13, %v651_v12  ;;  %v688_v24 = vmul.f32 0.70710677, %v1888_v14  ;;  %v1897_v25 = vadd.f32 %v1861_v11, %v568_v20  ;;  %v658_v9 = vmul.f32 0.5, %v1885_v8 }
 0x10e   : > { %1597 = verf.f32 %v690_v18  ;;  %v691_v28 = vmul.f32 0.70710677, %v1892_v19  ;;  %v777_v30 = vmul.f32 %v745_v21, %v649_v23  ;;  %v659_v10 = vmul.f32 0.5, %v1892_v19 }
 0x10f   : > { %1599 = verf.f32 %v688_v24  ;;  %v689_v27 = vmul.f32 0.70710677, %v1897_v25  ;;  %v839_v32 = vpack.c.bf16 %v779_v22, %v778_v26  ;;  %v656_v16 = vmul.f32 0.5, %v1888_v14 }
 0x110   : > { %v1590_v31 = vpop.eup %1589  ;;  %1601 = verf.f32 %v691_v28  ;;  %v838_v35 = vpack.c.bf16 %v777_v30, %v776_v29  ;;  %v657_v17 = vmul.f32 0.5, %v1897_v25 }
 0x111   : > { %v1592_v34 = vpop.eup %1591  ;;  %1603 = verf.f32 %v689_v27  ;;  %v1460_v33 = vpop.f32.mrb[16].mxu0  ;;  %v750_v36 = vadd.f32 1.0, %v1590_v31 }
 0x112   : > { %v1902_v37 = vadd.f32 %v1460_v33, %v1861_v11  ;;  %v581_v38 = vpop.f32.mrb[17].mxu0  ;;  %v1594_v39 = vpop.eup %1593  ;;  %v748_v41 = vadd.f32 1.0, %v1592_v34  ;;  %1494 = vmatprep.mubr.bf16.mxu1 %v838_v35 }
 0x113   : > { %v1906_v43 = vadd.f32 %v1861_v11, %v581_v38  ;;  %v1461_v44 = vpop.f32.mrb[18].mxu0  ;;  %v1596_v45 = vpop.eup %1595  ;;  %v751_v49 = vadd.f32 1.0, %v1594_v39  ;;  %1495 = vmatmul.mubr.bf16.vlgmr.msra.gmra.mrb[0].mxu1 %v839_v32  ;;  %v782_v55 = vmul.f32 %v750_v36, %v654_v40 }
 0x114   : > { %v694_v50 = vmul.f32 0.70710677, %v1902_v37  ;;  %v584_v51 = vpop.f32.mrb[19].mxu0  ;;  %v749_v53 = vadd.f32 1.0, %v1596_v45  ;;  %v1912_v42 = vadd.f32 %v1461_v44, %v1861_v11  ;;  %v780_v48 = vmul.f32 %v748_v41, %v652_v46 }
 0x115   : > { %v692_v54 = vmul.f32 0.70710677, %v1906_v43  ;;  %v783_v56 = vmul.f32 %v751_v49, %v655_v47  ;;  %v1915_v57 = vadd.f32 %v1861_v11, %v584_v51  ;;  %v662_v38 = vmul.f32 0.5, %v1902_v37 }
 0x116   : > { %1605 = verf.f32 %v694_v50  ;;  %v781_v58 = vmul.f32 %v749_v53, %v653_v52  ;;  %v695_v59 = vmul.f32 0.70710677, %v1912_v42  ;;  %v660_v45 = vmul.f32 0.5, %v1906_v43 }
 0x117   : > { %1607 = verf.f32 %v692_v54  ;;  %v693_v61 = vmul.f32 0.70710677, %v1915_v57  ;;  %v841_v62 = vpack.c.bf16 %v783_v56, %v782_v55  ;;  %v663_v46 = vmul.f32 0.5, %v1912_v42 }
 0x118   : > { %v1598_v60 = vpop.eup %1597  ;;  %1609 = verf.f32 %v695_v59  ;;  %v840_v2 = vpack.c.bf16 %v781_v58, %v780_v48  ;;  %v661_v51 = vmul.f32 0.5, %v1915_v57 }
 0x119   : > { %v1600_v63 = vpop.eup %1599  ;;  %v754_v0 = vadd.f32 1.0, %v1598_v60  ;;  %v1464_v1 = vpop.f32.mrb[20].mxu0  ;;  %1611 = verf.f32 %v693_v61 }
 0x11a   : > { %v1602_v3 = vpop.eup %1601  ;;  %v752_v4 = vadd.f32 1.0, %v1600_v63  ;;  %v1920_v5 = vadd.f32 %v1464_v1, %v1861_v11  ;;  %v597_v6 = vpop.f32.mrb[21].mxu0  ;;  %1498 = vmatprep.mubr.bf16.mxu1 %v840_v2 }
 0x11b   : > { %v1604_v7 = vpop.eup %1603  ;;  %v755_v12 = vadd.f32 1.0, %v1602_v3  ;;  %v1925_v13 = vadd.f32 %v1861_v11, %v597_v6  ;;  %v1465_v15 = vpop.f32.mrb[22].mxu0  ;;  %1499 = vmatmul.mubr.bf16.gmra.mrb[4].mxu1 %v841_v62  ;;  %v786_v22 = vmul.f32 %v754_v0, %v658_v9 }
 0x11c   : > { %v753_v18 = vadd.f32 1.0, %v1604_v7  ;;  %v698_v20 = vmul.f32 0.70710677, %v1920_v5  ;;  %v600_v21 = vpop.f32.mrb[23].mxu0  ;;  %v609_v19 = vadd.f32 %v1465_v15, %v1861_v11  ;;  %v784_v24 = vmul.f32 %v752_v4, %v656_v16 }
 0x11d   : > { %v787_v23 = vmul.f32 %v755_v12, %v659_v10  ;;  %v696_v8 = vmul.f32 0.70710677, %v1925_v13  ;;  %v601_v28 = vadd.f32 %v1861_v11, %v600_v21  ;;  %v666_v3 = vmul.f32 0.5, %v1920_v5 }
 0x11e   : > { %v785_v26 = vmul.f32 %v753_v18, %v657_v17  ;;  %1613 = verf.f32 %v698_v20  ;;  %v699_v14 = vmul.f32 0.70710677, %v609_v19  ;;  %v664_v10 = vmul.f32 0.5, %v1925_v13 }
 0x11f   : > { %1615 = verf.f32 %v696_v8  ;;  %v843_v27 = vpack.c.bf16 %v787_v23, %v786_v22  ;;  %v697_v29 = vmul.f32 0.70710677, %v601_v28  ;;  %v667_v12 = vmul.f32 0.5, %v609_v19 }
 0x120   : > { %v1606_v25 = vpop.eup %1605  ;;  %v842_v30 = vpack.c.bf16 %v785_v26, %v784_v24  ;;  %1617 = verf.f32 %v699_v14  ;;  %v665_v18 = vmul.f32 0.5, %v601_v28 }
 0x121   : > { %v1608_v31 = vpop.eup %1607  ;;  %v1468_v32 = vpop.f32.mrb[24].mxu0  ;;  %v758_v34 = vadd.f32 1.0, %v1606_v25  ;;  %1619 = verf.f32 %v697_v29 }
 0x122   : > { %v1934_v33 = vadd.f32 %v1468_v32, %v1861_v11  ;;  %v613_v35 = vpop.f32.mrb[25].mxu0  ;;  %1502 = vmatprep.mubr.bf16.mxu1 %v842_v30  ;;  %v1610_v36 = vpop.eup %1609  ;;  %v756_v39 = vadd.f32 1.0, %v1608_v31 }
 0x123   : > { %v1938_v40 = vadd.f32 %v1861_v11, %v613_v35  ;;  %v1469_v41 = vpop.f32.mrb[26].mxu0  ;;  %v1612_v44 = vpop.eup %1611  ;;  %v759_v47 = vadd.f32 1.0, %v1610_v36  ;;  %1503 = vmatmul.mubr.bf16.gmra.mrb[8].mxu1 %v843_v27  ;;  %v790_v54 = vmul.f32 %v758_v34, %v662_v38 }
 0x124   : > { %v702_v49 = vmul.f32 0.70710677, %v1934_v33  ;;  %v616_v50 = vpop.f32.mrb[27].mxu0  ;;  %v757_v52 = vadd.f32 1.0, %v1612_v44  ;;  %v625_v53 = vadd.f32 %v1469_v41, %v1861_v11  ;;  %v788_v43 = vmul.f32 %v756_v39, %v660_v45 }
 0x125   : > { %v700_v37 = vmul.f32 0.70710677, %v1938_v40  ;;  %v791_v55 = vmul.f32 %v759_v47, %v663_v46  ;;  %v617_v56 = vadd.f32 %v1861_v11, %v616_v50  ;;  %v670_v34 = vmul.f32 0.5, %v1934_v33 }
 0x126   : > { %1621 = verf.f32 %v702_v49  ;;  %v789_v48 = vmul.f32 %v757_v52, %v661_v51  ;;  %v703_v42 = vmul.f32 0.70710677, %v625_v53  ;;  %v671_v35 = vmul.f32 0.5, %v625_v53 }
 0x127   : > { %1623 = verf.f32 %v700_v37  ;;  %v701_v59 = vmul.f32 0.70710677, %v617_v56  ;;  %v845_v60 = vpack.c.bf16 %v791_v55, %v790_v54  ;;  %v668_v36 = vmul.f32 0.5, %v1938_v40 }
 0x128   : > { %v1614_v58 = vpop.eup %1613  ;;  %1625 = verf.f32 %v703_v42  ;;  %v844_v62 = vpack.c.bf16 %v789_v48, %v788_v43  ;;  %v669_v38 = vmul.f32 0.5, %v617_v56 }
 0x129   : > { %v1616_v61 = vpop.eup %1615  ;;  %v1472_v57 = vpop.f32.mrb[28].mxu0  ;;  %v762_v63 = vadd.f32 1.0, %v1614_v58  ;;  %1627 = verf.f32 %v701_v59 }
 0x12a   : > { %v638_v0 = vadd.f32 %v1472_v57, %v1861_v11  ;;  %v629_v1 = vpop.f32.mrb[29].mxu0  ;;  %v1618_v2 = vpop.eup %1617  ;;  %v760_v4 = vadd.f32 1.0, %v1616_v61  ;;  %1506 = vmatprep.mubr.bf16.mxu1 %v844_v62  ;;  %v806_v62 = vld [vmem:[#allocation2 + $0x10] sm:$0xff] }
 0x12b   : > { %v630_v6 = vadd.f32 %v1861_v11, %v629_v1  ;;  %v1473_v7 = vpop.f32.mrb[30].mxu0  ;;  %v1620_v9 = vpop.eup %1619  ;;  %v763_v15 = vadd.f32 1.0, %v1618_v2  ;;  %1507 = vmatmul.mubr.bf16.gmra.mrb[12].mxu1 %v845_v60  ;;  %v794_v23 = vmul.f32 %v762_v63, %v666_v3  ;;  %v804_v63 = vld [vmem:[#allocation2] sm:$0xff]  ;;  %v807_v2 = vld [vmem:[#allocation2 + $0x18] sm:$0xff] }
 0x12c   : > { %v706_v16 = vmul.f32 0.70710677, %v638_v0  ;;  %v632_v17 = vpop.f32.mrb[31].mxu0  ;;  %v761_v20 = vadd.f32 1.0, %v1620_v9  ;;  %v641_v22 = vadd.f32 %v1473_v7, %v1861_v11  ;;  %v792_v24 = vmul.f32 %v760_v4, %v664_v10  ;;  %v805_v4 = vld [vmem:[#allocation2 + $0x8] sm:$0xff] }
 0x12d   : > { %v704_v21 = vmul.f32 0.70710677, %v630_v6  ;;  %v795_v5 = vmul.f32 %v763_v15, %v667_v12  ;;  %v633_v8 = vadd.f32 %v1861_v11, %v632_v17  ;;  %v674_v53 = vmul.f32 0.5, %v638_v0  ;;  %v810_v15 = vld [vmem:[#allocation2 + $0x30] sm:$0xff]  ;;  %v808_v17 = vld [vmem:[#allocation2 + $0x20] sm:$0xff] }
 0x12e   : > { %1629 = verf.f32 %v706_v16  ;;  %v793_v26 = vmul.f32 %v761_v20, %v665_v18  ;;  %v707_v14 = vmul.f32 0.70710677, %v641_v22  ;;  %v675_v55 = vmul.f32 0.5, %v641_v22  ;;  %v1962_v16 = vld [vmem:[%s2108_s4] ss:$0 sm:$0xff]  ;;  %v811_v20 = vld [vmem:[#allocation2 + $0x38] sm:$0xff] }
 0x12f   : > { %1631 = verf.f32 %v704_v21  ;;  %v705_v19 = vmul.f32 0.70710677, %v633_v8  ;;  %v847_v27 = vpack.c.bf16 %v795_v5, %v794_v23  ;;  %v672_v40 = vmul.f32 0.5, %v630_v6  ;;  %v809_v5 = vld [vmem:[#allocation2 + $0x28] sm:$0xff] }
 0x130   : > { %v1622_v13 = vpop.eup %1621  ;;  %1633 = verf.f32 %v707_v14  ;;  %v846_v29 = vpack.c.bf16 %v793_v26, %v792_v24  ;;  %v673_v56 = vmul.f32 0.5, %v633_v8 }
 0x131   : > { %v1624_v25 = vpop.eup %1623  ;;  %v766_v28 = vadd.f32 1.0, %v1622_v13  ;;  %1635 = verf.f32 %v705_v19 }
 0x132   : > { %v1626_v30 = vpop.eup %1625  ;;  %v764_v31 = vadd.f32 1.0, %v1624_v25  ;;  %1510 = vmatprep.mubr.bf16.mxu1 %v846_v29 }
 0x133   : > { %v1628_v32 = vpop.eup %1627  ;;  %v767_v11 = vadd.f32 1.0, %v1626_v30  ;;  %1511 = vmatmul.mubr.bf16.gmra.mrb[16].mxu1 %v847_v27  ;;  %v798_v41 = vmul.f32 %v766_v28, %v670_v34  ;;  %v812_v34 = vld [vmem:[#allocation2 + $0x40] sm:$0xff] }
 0x134   : > { %v765_v39 = vadd.f32 1.0, %v1628_v32  ;;  %v796_v45 = vmul.f32 %v764_v31, %v668_v36  ;;  %v814_v32 = vld [vmem:[#allocation2 + $0x50] sm:$0xff] }
 0x135   : > { %v799_v44 = vmul.f32 %v767_v11, %v671_v35  ;;  %v815_v11 = vld [vmem:[#allocation2 + $0x58] sm:$0xff] }
 0x136   : > { %v797_v46 = vmul.f32 %v765_v39, %v669_v38  ;;  %v813_v39 = vld [vmem:[#allocation2 + $0x48] sm:$0xff] }
 0x137   : > { %v849_v49 = vpack.c.bf16 %v799_v44, %v798_v41 }
 0x138   : > { %v1630_v47 = vpop.eup %1629  ;;  %v848_v51 = vpack.c.bf16 %v797_v46, %v796_v45 }
 0x139   : > { %v1632_v50 = vpop.eup %1631  ;;  %v770_v52 = vadd.f32 1.0, %v1630_v47 }
 0x13a   : > { %v1634_v37 = vpop.eup %1633  ;;  %v768_v54 = vadd.f32 1.0, %v1632_v50  ;;  %1514 = vmatprep.mubr.bf16.mxu1 %v848_v51 }
 0x13b   : > { %v1636_v33 = vpop.eup %1635  ;;  %v771_v43 = vadd.f32 1.0, %v1634_v37  ;;  %1515 = vmatmul.mubr.bf16.gmra.mrb[20].mxu1 %v849_v49  ;;  %v802_v42 = vmul.f32 %v770_v52, %v674_v53 }
 0x13c   : > { %v769_v48 = vadd.f32 1.0, %v1636_v33  ;;  %v800_v59 = vmul.f32 %v768_v54, %v672_v40 }
 0x13d   : > { %v803_v58 = vmul.f32 %v771_v43, %v675_v55  ;;  %v818_v55 = vld [vmem:[#allocation2 + $0x70] sm:$0xff]  ;;  %v816_v43 = vld [vmem:[#allocation2 + $0x60] sm:$0xff] }
 0x13e   : > { %v801_v60 = vmul.f32 %v769_v48, %v673_v56  ;;  %v819_v56 = vld [vmem:[#allocation2 + $0x78] sm:$0xff] }
 0x13f   : > { %v851_v61 = vpack.c.bf16 %v803_v58, %v802_v42  ;;  %v817_v58 = vld [vmem:[#allocation2 + $0x68] sm:$0xff] }
 0x140   : > { %v850_v57 = vpack.c.bf16 %v801_v60, %v800_v59 }
 0x142   : > { %1518 = vmatprep.mubr.bf16.mxu1 %v850_v57 }
 0x143   : > { %1519 = vmatmul.mubr.bf16.gmra.mrb[24].mxu1 %v851_v61 }
 0x1de   : > { %v1492_v1 = vpop.f32.mrb[32].mxu0 }
 0x1df   : > { %v1079_v3 = vadd.f32 %v1492_v1, %v806_v62  ;;  %v950_v0 = vpop.f32.mrb[33].mxu0 }
 0x1e0   : > { %v1077_v7 = vadd.f32 %v950_v0, %v804_v63  ;;  %v1493_v6 = vpop.f32.mrb[34].mxu0 }
 0x1e1   : > { %1111 = vst.msk [vmem:[#allocation2 + $0x10] sm:$0xff] %vm298_vm0, %v1079_v3  ;;  %v1080_v9 = vadd.f32 %v1493_v6, %v807_v2  ;;  %v953_v10 = vpop.f32.mrb[35].mxu0 }
 0x1e2   : > { %1109 = vst.msk [vmem:[#allocation2] sm:$0xff] %vm298_vm0, %v1077_v7  ;;  %v1078_v12 = vadd.f32 %v953_v10, %v805_v4  ;;  %v820_v10 = vld [vmem:[#allocation2 + $0x80] sm:$0xff] }
 0x1e3   : > { %1112 = vst.msk [vmem:[#allocation2 + $0x18] sm:$0xff] %vm298_vm0, %v1080_v9  ;;  %v822_v9 = vld [vmem:[#allocation2 + $0x90] sm:$0xff] }
 0x1e4   : > { %1110 = vst.msk [vmem:[#allocation2 + $0x8] sm:$0xff] %vm298_vm0, %v1078_v12 }
 0x1e6   : > { %v1496_v18 = vpop.f32.mrb[0].mxu1 }
 0x1e7   : > { %v1083_v22 = vadd.f32 %v1496_v18, %v810_v15  ;;  %v966_v23 = vpop.f32.mrb[1].mxu1  ;;  %v823_v15 = vld [vmem:[#allocation2 + $0x98] sm:$0xff] }
 0x1e8   : > { %v1146_v21 = vld [vmem:[#allocation2 + $0x10] sm:$0xff]  ;;  %v1081_v26 = vadd.f32 %v966_v23, %v808_v17  ;;  %v1497_v14 = vpop.f32.mrb[2].mxu1 }
 0x1e9   : > { %v1185_v8 = vadd.f32 %v1962_v16, %v1146_v21  ;;  %v1144_v24 = vld [vmem:[#allocation2] sm:$0xff]  ;;  %1115 = vst.msk [vmem:[#allocation2 + $0x30] sm:$0xff] %vm298_vm0, %v1083_v22  ;;  %v1084_v27 = vadd.f32 %v1497_v14, %v811_v20  ;;  %v969_v25 = vpop.f32.mrb[3].mxu1  ;;  %v821_v20 = vld [vmem:[#allocation2 + $0x88] sm:$0xff] }
 0x1ea   : > { %v1183_v13 = vadd.f32 %v1962_v16, %v1144_v24  ;;  %v1147_v19 = vld [vmem:[#allocation2 + $0x18] sm:$0xff]  ;;  %1113 = vst.msk [vmem:[#allocation2 + $0x20] sm:$0xff] %vm298_vm0, %v1081_v26  ;;  %v1082_v30 = vadd.f32 %v969_v25, %v809_v5 }
 0x1eb   : > { %1217 = vst.msk [vmem:[%s1969_s8 + $0x10] sm:$0xff] %vm298_vm0, %v1185_v8  ;;  %v1186_v29 = vadd.f32 %v1962_v16, %v1147_v19  ;;  %v1145_v28 = vld [vmem:[#allocation2 + $0x8] sm:$0xff]  ;;  %1116 = vst.msk [vmem:[#allocation2 + $0x38] sm:$0xff] %vm298_vm0, %v1084_v27 }
 0x1ec   : > { %1215 = vst.msk [vmem:[%s1969_s8] sm:$0xff] %vm298_vm0, %v1183_v13  ;;  %v1184_v31 = vadd.f32 %v1962_v16, %v1145_v28  ;;  %1114 = vst.msk [vmem:[#allocation2 + $0x28] sm:$0xff] %vm298_vm0, %v1082_v30  ;;  %v826_v28 = vld [vmem:[#allocation2 + $0xb0] sm:$0xff]  ;;  %v824_v30 = vld [vmem:[#allocation2 + $0xa0] sm:$0xff] }
 0x1ed   : > { %1218 = vst.msk [vmem:[%s1969_s8 + $0x18] sm:$0xff] %vm298_vm0, %v1186_v29 }
 0x1ee   : > { %1216 = vst.msk [vmem:[%s1969_s8 + $0x8] sm:$0xff] %vm298_vm0, %v1184_v31  ;;  %v1500_v35 = vpop.f32.mrb[4].mxu1 }
 0x1ef   : > { %v1087_v36 = vadd.f32 %v1500_v35, %v814_v32  ;;  %v982_v38 = vpop.f32.mrb[5].mxu1  ;;  %v827_v32 = vld [vmem:[#allocation2 + $0xb8] sm:$0xff] }
 0x1f0   : > { %v1150_v41 = vld [vmem:[#allocation2 + $0x30] sm:$0xff]  ;;  %v1085_v44 = vadd.f32 %v982_v38, %v812_v34  ;;  %v1501_v45 = vpop.f32.mrb[6].mxu1 }
 0x1f1   : > { %v1189_v46 = vadd.f32 %v1962_v16, %v1150_v41  ;;  %v1148_v47 = vld [vmem:[#allocation2 + $0x20] sm:$0xff]  ;;  %1119 = vst.msk [vmem:[#allocation2 + $0x50] sm:$0xff] %vm298_vm0, %v1087_v36  ;;  %v1088_v49 = vadd.f32 %v1501_v45, %v815_v11  ;;  %v985_v50 = vpop.f32.mrb[7].mxu1  ;;  %v825_v11 = vld [vmem:[#allocation2 + $0xa8] sm:$0xff] }
 0x1f2   : > { %v1187_v51 = vadd.f32 %v1962_v16, %v1148_v47  ;;  %v1151_v52 = vld [vmem:[#allocation2 + $0x38] sm:$0xff]  ;;  %1117 = vst.msk [vmem:[#allocation2 + $0x40] sm:$0xff] %vm298_vm0, %v1085_v44  ;;  %v1086_v37 = vadd.f32 %v985_v50, %v813_v39 }
 0x1f3   : > { %1221 = vst.msk [vmem:[%s1969_s8 + $0x30] sm:$0xff] %vm298_vm0, %v1189_v46  ;;  %v1190_v54 = vadd.f32 %v1962_v16, %v1151_v52  ;;  %v1149_v33 = vld [vmem:[#allocation2 + $0x28] sm:$0xff]  ;;  %1120 = vst.msk [vmem:[#allocation2 + $0x58] sm:$0xff] %vm298_vm0, %v1088_v49 }
 0x1f4   : > { %1219 = vst.msk [vmem:[%s1969_s8 + $0x20] sm:$0xff] %vm298_vm0, %v1187_v51  ;;  %v1188_v53 = vadd.f32 %v1962_v16, %v1149_v33  ;;  %1118 = vst.msk [vmem:[#allocation2 + $0x48] sm:$0xff] %vm298_vm0, %v1086_v37  ;;  %v828_v33 = vld [vmem:[#allocation2 + $0xc0] sm:$0xff] }
 0x1f5   : > { %1222 = vst.msk [vmem:[%s1969_s8 + $0x38] sm:$0xff] %vm298_vm0, %v1190_v54  ;;  %v830_v54 = vld [vmem:[#allocation2 + $0xd0] sm:$0xff] }
 0x1f6   : > { %1220 = vst.msk [vmem:[%s1969_s8 + $0x28] sm:$0xff] %vm298_vm0, %v1188_v53  ;;  %v1504_v40 = vpop.f32.mrb[8].mxu1 }
 0x1f7   : > { %v1091_v48 = vadd.f32 %v1504_v40, %v818_v55  ;;  %v998_v42 = vpop.f32.mrb[9].mxu1  ;;  %v831_v55 = vld [vmem:[#allocation2 + $0xd8] sm:$0xff] }
 0x1f8   : > { %v1154_v59 = vld [vmem:[#allocation2 + $0x50] sm:$0xff]  ;;  %v1089_v60 = vadd.f32 %v998_v42, %v816_v43  ;;  %v1505_v61 = vpop.f32.mrb[10].mxu1 }
 0x1f9   : > { %v1193_v57 = vadd.f32 %v1962_v16, %v1154_v59  ;;  %v1152_v62 = vld [vmem:[#allocation2 + $0x40] sm:$0xff]  ;;  %1123 = vst.msk [vmem:[#allocation2 + $0x70] sm:$0xff] %vm298_vm0, %v1091_v48  ;;  %v1092_v63 = vadd.f32 %v1505_v61, %v819_v56  ;;  %v1001_v1 = vpop.f32.mrb[11].mxu1  ;;  %v829_v56 = vld [vmem:[#allocation2 + $0xc8] sm:$0xff] }
 0x1fa   : > { %v1191_v2 = vadd.f32 %v1962_v16, %v1152_v62  ;;  %v1155_v3 = vld [vmem:[#allocation2 + $0x58] sm:$0xff]  ;;  %1121 = vst.msk [vmem:[#allocation2 + $0x60] sm:$0xff] %vm298_vm0, %v1089_v60  ;;  %v1090_v0 = vadd.f32 %v1001_v1, %v817_v58 }
 0x1fb   : > { %1225 = vst.msk [vmem:[%s1969_s8 + $0x50] sm:$0xff] %vm298_vm0, %v1193_v57  ;;  %v1194_v4 = vadd.f32 %v1962_v16, %v1155_v3  ;;  %v1153_v7 = vld [vmem:[#allocation2 + $0x48] sm:$0xff]  ;;  %1124 = vst.msk [vmem:[#allocation2 + $0x78] sm:$0xff] %vm298_vm0, %v1092_v63 }
 0x1fc   : > { %1223 = vst.msk [vmem:[%s1969_s8 + $0x40] sm:$0xff] %vm298_vm0, %v1191_v2  ;;  %v1192_v6 = vadd.f32 %v1962_v16, %v1153_v7  ;;  %1122 = vst.msk [vmem:[#allocation2 + $0x68] sm:$0xff] %vm298_vm0, %v1090_v0  ;;  %v832_v7 = vld [vmem:[#allocation2 + $0xe0] sm:$0xff] }
 0x1fd   : > { %1226 = vst.msk [vmem:[%s1969_s8 + $0x58] sm:$0xff] %vm298_vm0, %v1194_v4  ;;  %v834_v4 = vld [vmem:[#allocation2 + $0xf0] sm:$0xff] }
 0x1fe   : > { %1224 = vst.msk [vmem:[%s1969_s8 + $0x48] sm:$0xff] %vm298_vm0, %v1192_v6  ;;  %v1508_v12 = vpop.f32.mrb[12].mxu1 }
 0x1ff   : > { %v1095_v17 = vadd.f32 %v1508_v12, %v822_v9  ;;  %v1014_v18 = vpop.f32.mrb[13].mxu1  ;;  %v835_v9 = vld [vmem:[#allocation2 + $0xf8] sm:$0xff] }
 0x200   : > { %v1158_v21 = vld [vmem:[#allocation2 + $0x70] sm:$0xff]  ;;  %v1093_v22 = vadd.f32 %v1014_v18, %v820_v10  ;;  %v1509_v23 = vpop.f32.mrb[14].mxu1 }
 0x201   : > { %v1197_v5 = vadd.f32 %v1962_v16, %v1158_v21  ;;  %v1156_v8 = vld [vmem:[#allocation2 + $0x60] sm:$0xff]  ;;  %1127 = vst.msk [vmem:[#allocation2 + $0x90] sm:$0xff] %vm298_vm0, %v1095_v17  ;;  %v1096_v24 = vadd.f32 %v1509_v23, %v823_v15  ;;  %v1017_v26 = vpop.f32.mrb[15].mxu1  ;;  %v833_v15 = vld [vmem:[#allocation2 + $0xe8] sm:$0xff] }
 0x202   : > { %v1195_v14 = vadd.f32 %v1962_v16, %v1156_v8  ;;  %v1159_v13 = vld [vmem:[#allocation2 + $0x78] sm:$0xff]  ;;  %1125 = vst.msk [vmem:[#allocation2 + $0x80] sm:$0xff] %vm298_vm0, %v1093_v22  ;;  %v1094_v19 = vadd.f32 %v1017_v26, %v821_v20 }
 0x203   : > { %1229 = vst.msk [vmem:[%s1969_s8 + $0x70] sm:$0xff] %vm298_vm0, %v1197_v5  ;;  %v1198_v27 = vadd.f32 %v1962_v16, %v1159_v13  ;;  %v1157_v25 = vld [vmem:[#allocation2 + $0x68] sm:$0xff]  ;;  %1128 = vst.msk [vmem:[#allocation2 + $0x98] sm:$0xff] %vm298_vm0, %v1096_v24 }
 0x204   : > { %1227 = vst.msk [vmem:[%s1969_s8 + $0x60] sm:$0xff] %vm298_vm0, %v1195_v14  ;;  %v1196_v29 = vadd.f32 %v1962_v16, %v1157_v25  ;;  %1126 = vst.msk [vmem:[#allocation2 + $0x88] sm:$0xff] %vm298_vm0, %v1094_v19 }
 0x205   : > { %1230 = vst.msk [vmem:[%s1969_s8 + $0x78] sm:$0xff] %vm298_vm0, %v1198_v27 }
 0x206   : > { %1228 = vst.msk [vmem:[%s1969_s8 + $0x68] sm:$0xff] %vm298_vm0, %v1196_v29  ;;  %v1512_v31 = vpop.f32.mrb[16].mxu1 }
 0x207   : > { %v1099_v34 = vadd.f32 %v1512_v31, %v826_v28  ;;  %v1030_v35 = vpop.f32.mrb[17].mxu1 }
 0x208   : > { %v1162_v36 = vld [vmem:[#allocation2 + $0x90] sm:$0xff]  ;;  %v1097_v38 = vadd.f32 %v1030_v35, %v824_v30  ;;  %v1513_v39 = vpop.f32.mrb[18].mxu1 }
 0x209   : > { %v1201_v41 = vadd.f32 %v1962_v16, %v1162_v36  ;;  %v1160_v44 = vld [vmem:[#allocation2 + $0x80] sm:$0xff]  ;;  %1131 = vst.msk [vmem:[#allocation2 + $0xb0] sm:$0xff] %vm298_vm0, %v1099_v34  ;;  %v1100_v45 = vadd.f32 %v1513_v39, %v827_v32  ;;  %v1033_v46 = vpop.f32.mrb[19].mxu1 }
 0x20a   : > { %v1199_v47 = vadd.f32 %v1962_v16, %v1160_v44  ;;  %v1163_v49 = vld [vmem:[#allocation2 + $0x98] sm:$0xff]  ;;  %1129 = vst.msk [vmem:[#allocation2 + $0xa0] sm:$0xff] %vm298_vm0, %v1097_v38  ;;  %v1098_v50 = vadd.f32 %v1033_v46, %v825_v11 }
 0x20b   : > { %1233 = vst.msk [vmem:[%s1969_s8 + $0x90] sm:$0xff] %vm298_vm0, %v1201_v41  ;;  %v1202_v51 = vadd.f32 %v1962_v16, %v1163_v49  ;;  %v1161_v52 = vld [vmem:[#allocation2 + $0x88] sm:$0xff]  ;;  %1132 = vst.msk [vmem:[#allocation2 + $0xb8] sm:$0xff] %vm298_vm0, %v1100_v45 }
 0x20c   : > { %1231 = vst.msk [vmem:[%s1969_s8 + $0x80] sm:$0xff] %vm298_vm0, %v1199_v47  ;;  %v1200_v37 = vadd.f32 %v1962_v16, %v1161_v52  ;;  %1130 = vst.msk [vmem:[#allocation2 + $0xa8] sm:$0xff] %vm298_vm0, %v1098_v50 }
 0x20d   : > { %1234 = vst.msk [vmem:[%s1969_s8 + $0x98] sm:$0xff] %vm298_vm0, %v1202_v51 }
 0x20e   : > { %1232 = vst.msk [vmem:[%s1969_s8 + $0x88] sm:$0xff] %vm298_vm0, %v1200_v37  ;;  %v1516_v53 = vpop.f32.mrb[20].mxu1 }
 0x20f   : > { %v1103_v43 = vadd.f32 %v1516_v53, %v830_v54  ;;  %v1046_v40 = vpop.f32.mrb[21].mxu1 }
 0x210   : > { %v1166_v48 = vld [vmem:[#allocation2 + $0xb0] sm:$0xff]  ;;  %v1101_v42 = vadd.f32 %v1046_v40, %v828_v33  ;;  %v1517_v58 = vpop.f32.mrb[22].mxu1 }
 0x211   : > { %v1205_v59 = vadd.f32 %v1962_v16, %v1166_v48  ;;  %v1164_v60 = vld [vmem:[#allocation2 + $0xa0] sm:$0xff]  ;;  %1135 = vst.msk [vmem:[#allocation2 + $0xd0] sm:$0xff] %vm298_vm0, %v1103_v43  ;;  %v1104_v61 = vadd.f32 %v1517_v58, %v831_v55  ;;  %v1049_v57 = vpop.f32.mrb[23].mxu1 }
 0x212   : > { %v1203_v62 = vadd.f32 %v1962_v16, %v1164_v60  ;;  %v1167_v63 = vld [vmem:[#allocation2 + $0xb8] sm:$0xff]  ;;  %1133 = vst.msk [vmem:[#allocation2 + $0xc0] sm:$0xff] %vm298_vm0, %v1101_v42  ;;  %v1102_v1 = vadd.f32 %v1049_v57, %v829_v56 }
 0x213   : > { %1237 = vst.msk [vmem:[%s1969_s8 + $0xb0] sm:$0xff] %vm298_vm0, %v1205_v59  ;;  %v1206_v2 = vadd.f32 %v1962_v16, %v1167_v63  ;;  %v1165_v3 = vld [vmem:[#allocation2 + $0xa8] sm:$0xff]  ;;  %1136 = vst.msk [vmem:[#allocation2 + $0xd8] sm:$0xff] %vm298_vm0, %v1104_v61 }
 0x214   : > { %1235 = vst.msk [vmem:[%s1969_s8 + $0xa0] sm:$0xff] %vm298_vm0, %v1203_v62  ;;  %v1204_v0 = vadd.f32 %v1962_v16, %v1165_v3  ;;  %1134 = vst.msk [vmem:[#allocation2 + $0xc8] sm:$0xff] %vm298_vm0, %v1102_v1 }
 0x215   : > { %1238 = vst.msk [vmem:[%s1969_s8 + $0xb8] sm:$0xff] %vm298_vm0, %v1206_v2 }
 0x216   : > { %1236 = vst.msk [vmem:[%s1969_s8 + $0xa8] sm:$0xff] %vm298_vm0, %v1204_v0  ;;  %v1520_v6 = vpop.f32.mrb[24].mxu1 }
 0x217   : > { %v1107_v10 = vadd.f32 %v1520_v6, %v834_v4  ;;  %v1062_v12 = vpop.f32.mrb[25].mxu1 }
 0x218   : > { %v1170_v17 = vld [vmem:[#allocation2 + $0xd0] sm:$0xff]  ;;  %v1105_v18 = vadd.f32 %v1062_v12, %v832_v7  ;;  %v1521_v20 = vpop.f32.mrb[26].mxu1 }
 0x219   : > { %v1209_v21 = vadd.f32 %v1962_v16, %v1170_v17  ;;  %v1168_v22 = vld [vmem:[#allocation2 + $0xc0] sm:$0xff]  ;;  %1139 = vst.msk [vmem:[#allocation2 + $0xf0] sm:$0xff] %vm298_vm0, %v1107_v10  ;;  %v1108_v23 = vadd.f32 %v1521_v20, %v835_v9  ;;  %v1065_v5 = vpop.f32.mrb[27].mxu1 }
 0x21a   : > { %v1207_v8 = vadd.f32 %v1962_v16, %v1168_v22  ;;  %v1171_v24 = vld [vmem:[#allocation2 + $0xd8] sm:$0xff]  ;;  %1137 = vst.msk [vmem:[#allocation2 + $0xe0] sm:$0xff] %vm298_vm0, %v1105_v18  ;;  %v1106_v26 = vadd.f32 %v1065_v5, %v833_v15 }
 0x21b   : > { %1241 = vst.msk [vmem:[%s1969_s8 + $0xd0] sm:$0xff] %vm298_vm0, %v1209_v21  ;;  %v1210_v14 = vadd.f32 %v1962_v16, %v1171_v24  ;;  %v1169_v13 = vld [vmem:[#allocation2 + $0xc8] sm:$0xff]  ;;  %1140 = vst.msk [vmem:[#allocation2 + $0xf8] sm:$0xff] %vm298_vm0, %v1108_v23 }
 0x21c   : > { %1239 = vst.msk [vmem:[%s1969_s8 + $0xc0] sm:$0xff] %vm298_vm0, %v1207_v8  ;;  %v1208_v19 = vadd.f32 %v1962_v16, %v1169_v13  ;;  %1138 = vst.msk [vmem:[#allocation2 + $0xe8] sm:$0xff] %vm298_vm0, %v1106_v26 }
 0x21d   : > { %1242 = vst.msk [vmem:[%s1969_s8 + $0xd8] sm:$0xff] %vm298_vm0, %v1210_v14 }
 0x21e   : > { %1240 = vst.msk [vmem:[%s1969_s8 + $0xc8] sm:$0xff] %vm298_vm0, %v1208_v19 }
 0x220   : > { %v1174_v27 = vld [vmem:[#allocation2 + $0xf0] sm:$0xff] }
 0x221   : > { %v1213_v25 = vadd.f32 %v1962_v16, %v1174_v27  ;;  %v1172_v29 = vld [vmem:[#allocation2 + $0xe0] sm:$0xff] }
 0x222   : > { %v1211_v28 = vadd.f32 %v1962_v16, %v1172_v29  ;;  %v1175_v30 = vld [vmem:[#allocation2 + $0xf8] sm:$0xff] }
 0x223   : > { %1245 = vst.msk [vmem:[%s1969_s8 + $0xf0] sm:$0xff] %vm298_vm0, %v1213_v25  ;;  %v1214_v31 = vadd.f32 %v1962_v16, %v1175_v30  ;;  %v1173_v32 = vld [vmem:[#allocation2 + $0xe8] sm:$0xff] }
 0x224   : > { %1243 = vst.msk [vmem:[%s1969_s8 + $0xe0] sm:$0xff] %vm298_vm0, %v1211_v28  ;;  %v1212_v34 = vadd.f32 %v1962_v16, %v1173_v32 }
 0x225   : > { %1246 = vst.msk [vmem:[%s1969_s8 + $0xf8] sm:$0xff] %vm298_vm0, %v1214_v31 }
 0x226   : > { %1244 = vst.msk [vmem:[%s1969_s8 + $0xe8] sm:$0xff] %vm298_vm0, %v1212_v34 }
 0x227 PF: > { %s15_s20 = sadd.s32 1, %s1659_s20   ;;  %s2110_s18 = smov %s1655_s19 }
 0x228   : > { %p12_p5 = scmp.ge.s32.totalorder %s15_s20, 4   ;;  %s2111_s19 = smov %s2113_s21 }
 0x22a   :  { %14 = sbr.rel (!%p12_p5) target bundleno = 2 (0x2), region = 87 }

</bundles_post_ra>
